<compile_context>
chip_gen: v7x
topology: tpu7x:2x2x1
jax: 0.10.0
libtpu: 0.0.40
codegen_flags: <defaults>
</compile_context>

<pallas_src>
import functools

import jax
import jax.numpy as jnp
from jax import lax
from jax.experimental import pallas as pl
from jax.experimental.pallas import tpu as pltpu


P_TILE_MAX = 1024      # lanes per output tile (multiple of 128); compromise
                       # between v6e (1-2K good) and v7x (<=1K, 64 MiB VMEM)
SINGLE_K_MAX = 4096    # keep a single un-tiled contraction up to this CKK


def _round_up(x, m):
    return ((x + m - 1) // m) * m


def _cdiv(a, b):
    return (a + b - 1) // b


# ------------------------------- kernels ----------------------------------- #

def _mm_bias_kernel(w_ref, p_ref, b_ref, o_ref):
    # Single-shot contraction: w (Cout, CKK) x p (CKK, TP) + b (Cout, 1).
    # No K grid axis -> no accumulator scratch, no init/finalize, Mosaic can
    # keep the accumulation inside the MXU result buffer.
    o_ref[...] = (jnp.dot(w_ref[...], p_ref[...],
                          preferred_element_type=jnp.float32) + b_ref[...])


def _mm_bias_ktiled_kernel(w_ref, p_ref, b_ref, o_ref):
    # Fallback for very large CKK (tk=256): accumulate directly into the
    # resident f32 output block, initialized with the bias at k == 0, so there
    # is no scratch accumulator and no finalize copy.
    @pl.when(pl.program_id(1) == 0)
    def _():
        o_ref[...] = jnp.broadcast_to(b_ref[...], o_ref.shape)

    o_ref[...] += jnp.dot(w_ref[...], p_ref[...],
                          preferred_element_type=jnp.float32)


# ------------------------------ tiling glue --------------------------------- #

def _pick_p_tile(p):
    """Lane tile (multiple of 128).  Prefer >= 2 tiles so the 'parallel' grid
    axis can be sharded across both TensorCores on v7x."""
    n128 = _cdiv(p, 128)
    chunks = min(P_TILE_MAX // 128, max(1, n128 // 2))
    tp = chunks * 128
    n_p = _cdiv(n128, chunks)
    return tp, n_p * tp


def _conv_matmul_bias(w, slab, b):
    """w: (Cout, CKK), slab: (CKK, P) -- both already in the MXU compute dtype
    (bf16 here); b: (Cout,) f32.  Returns (Cout, P) f32 via the Pallas kernel."""
    cout, ckk = w.shape
    ckk2, p = slab.shape
    assert ckk == ckk2
    itemsize = jnp.dtype(w.dtype).itemsize

    cout_pad = _round_up(cout, 16)          # bf16 packs two rows per sublane
    tp, p_pad = _pick_p_tile(p)
    n_p = p_pad // tp

    if ckk <= SINGLE_K_MAX:
        # Single un-tiled contraction.  CKK only padded to the bf16 sublane
        # multiple (no-op for realistic channel counts: Cin*9 % 16 == 0 for
        # Cin >= 16); the pad fuses with the slab-producing transpose/convert.
        ckk_pad = _round_up(ckk, 16)
        tk, n_k = ckk_pad, 1
        kernel = _mm_bias_kernel
    else:
        tk = 256                            # v6e/v7x MXU is 2x256^2; on v5e this
        ckk_pad = _round_up(ckk, tk)        # only trims grid-step overhead
        n_k = ckk_pad // tk
        kernel = _mm_bias_ktiled_kernel

    w_p = w
    if cout_pad != cout or ckk_pad != ckk:
        w_p = jnp.pad(w, ((0, cout_pad - cout), (0, ckk_pad - ckk)))
    s_p = slab
    if ckk_pad != ckk or p_pad != p:
        s_p = jnp.pad(slab, ((0, ckk_pad - ckk), (0, p_pad - p)))
    b_p = jnp.pad(b.astype(jnp.float32), (0, cout_pad - cout)).reshape(cout_pad, 1)

    # VMEM budget from the actual tile footprint (inputs/outputs double-buffered).
    need = 2 * (cout_pad * tk * itemsize      # weight block
                + tk * tp * itemsize          # slab block
                + cout_pad * 4                # bias block
                + cout_pad * tp * 4)          # f32 output block
    vmem_limit = min(max(4 * need + (2 << 20), 16 << 20), 60 << 20)

    cost = pl.CostEstimate(
        flops=2 * cout_pad * ckk_pad * p_pad,
        transcendentals=0,
        bytes_accessed=(w_p.size + s_p.size) * itemsize
                       + b_p.size * 4 + cout_pad * p_pad * 4)

    if n_k == 1:
        grid = (n_p,)
        in_specs = [
            pl.BlockSpec((cout_pad, ckk_pad), lambda i: (0, 0)),
            pl.BlockSpec((ckk_pad, tp), lambda i: (0, i)),
            pl.BlockSpec((cout_pad, 1), lambda i: (0, 0)),
        ]
        out_spec = pl.BlockSpec((cout_pad, tp), lambda i: (0, i))
        semantics = ("parallel",)
    else:
        grid = (n_p, n_k)
        in_specs = [
            pl.BlockSpec((cout_pad, tk), lambda i, k: (0, k)),
            pl.BlockSpec((tk, tp), lambda i, k: (k, i)),
            pl.BlockSpec((cout_pad, 1), lambda i, k: (0, 0)),
        ]
        out_spec = pl.BlockSpec((cout_pad, tp), lambda i, k: (0, i))
        semantics = ("parallel", "arbitrary")

    out = pl.pallas_call(
        kernel,
        out_shape=jax.ShapeDtypeStruct((cout_pad, p_pad), jnp.float32),
        grid_spec=pltpu.PrefetchScalarGridSpec(
            num_scalar_prefetch=0,
            grid=grid,
            in_specs=in_specs,
            out_specs=out_spec),
        compiler_params=pltpu.CompilerParams(
            dimension_semantics=semantics,
            vmem_limit_bytes=vmem_limit),
        cost_estimate=cost,
    )(w_p, s_p, b_p)
    return out[:cout, :p]


# ------------------------------ JAX glue ------------------------------------ #

def _deform_sampled_slab(x, offset, K, stride, pad, dil=1,
                         out_dtype=jnp.bfloat16):
    """Bilinear-sampled im2col slab (C*K*K, N*Hout*Wout), torchvision
    semantics, emitted directly in `out_dtype` at its final layout.

    # TODO(synk): the data-dependent 4-corner gather has no rectangular
    # BlockSpec form; it stays in the (fused) XLA wrapper.  Moving it into a
    # Pallas kernel that keeps x resident in VMEM (offsets via scalar prefetch)
    # would remove the remaining C*K*K slab round-trip through HBM.
    """
    N, C, H, W = x.shape
    _, _, Hout, Wout = offset.shape
    KK = K * K
    P = Hout * Wout

    # Native NCHW offset layout: channel 2*kk -> dy, 2*kk+1 -> dx.
    off = offset.reshape(N, KK, 2, P)
    off_y = off[:, :, 0]                                    # (N, KK, P)
    off_x = off[:, :, 1]

    ii = (jnp.arange(KK) // K).astype(jnp.float32)
    jj = (jnp.arange(KK) % K).astype(jnp.float32)
    gy = jnp.arange(Hout, dtype=jnp.float32) * stride - pad
    gx = jnp.arange(Wout, dtype=jnp.float32) * stride - pad
    base_y = jnp.broadcast_to(gy[None, :, None] + ii[:, None, None] * dil,
                              (KK, Hout, Wout)).reshape(1, KK, P)
    base_x = jnp.broadcast_to(gx[None, None, :] + jj[:, None, None] * dil,
                              (KK, Hout, Wout)).reshape(1, KK, P)

    y = base_y + off_y                                      # (N, KK, P)
    xq = base_x + off_x
    sample_ok = (y > -1.0) & (y < H) & (xq > -1.0) & (xq < W)

    y0f, x0f = jnp.floor(y), jnp.floor(xq)
    ly, lx = y - y0f, xq - x0f
    hy, hx = 1.0 - ly, 1.0 - lx
    y0, x0 = y0f.astype(jnp.int32), x0f.astype(jnp.int32)
    y1, x1 = y0 + 1, x0 + 1

    # Row-contiguous gather source: (N, H*W, C), each corner fetch is a C-row.
    x_rows = x.transpose(0, 2, 3, 1).reshape(N, H * W, C)

    def corner(yi, xi, wgt):
        ok = sample_ok & (yi >= 0) & (yi <= H - 1) & (xi >= 0) & (xi <= W - 1)
        w_eff = jnp.where(ok, wgt, 0.0)                     # mask folded in
        idx = (jnp.clip(yi, 0, H - 1) * W
               + jnp.clip(xi, 0, W - 1)).reshape(N, KK * P)
        rows = jax.vmap(lambda a, i: a[i])(x_rows, idx)     # (N, KK*P, C)
        return rows.reshape(N, KK, P, C) * w_eff[..., None]

    sampled = (corner(y0, x0, hy * hx) + corner(y0, x1, hy * lx)
               + corner(y1, x0, ly * hx) + corner(y1, x1, ly * lx))
    # (N, KK, P, C) -> (C, KK, N, P) -> (C*KK, N*P), matching w.reshape(Cout, C*KK).
    return sampled.transpose(3, 1, 0, 2).reshape(C * KK, N * P).astype(out_dtype)


def deform_conv2d_forward(x, w_off, b_off, w_def, b_def, K, stride, pad):
    """DeformConv2d forward (deform_groups=1, dilation=1, no modulation mask)."""
    N, Cin, H, W = x.shape
    Cout = w_def.shape[0]
    CKK = Cin * K * K

    # 1) offset-producing conv, kept in f32 (outputs are sampling coordinates).
    #    lax.conv avoids materializing a 9x im2col slab of x in HBM.
    # TODO(synk): could be folded back into Pallas by forming the K*K taps
    # in-kernel from halo'ed x tiles; delegated to XLA's native conv for now.
    offset = lax.conv_general_dilated(
        x, w_off, window_strides=(stride, stride),
        padding=((pad, pad), (pad, pad)),
        dimension_numbers=("NCHW", "OIHW", "NCHW"))
    offset = offset + b_off[None, :, None, None]
    Hout, Wout = offset.shape[2], offset.shape[3]

    # 2) deformable conv: fused bilinear gather in XLA -> bf16 slab,
    #    matmul + bias on the MXU in Pallas, f32 accumulation/output.
    sampled = _deform_sampled_slab(x, offset, K, stride, pad)
    out = _conv_matmul_bias(
        w_def.reshape(Cout, CKK).astype(jnp.bfloat16), sampled, b_def)
    return out.reshape(Cout, N, Hout, Wout).transpose(1, 0, 2, 3)


# --------------------------------- main ------------------------------------- #

if __name__ == "__main__":
    # module config: first entries of ks/ss/ps -> ks=3, ss=1, ps=1
    N, Cin, H, W = 2, 4, 16, 16
    Cout, K, stride, pad = 8, 3, 1, 1

    key = jax.random.PRNGKey(0)
    k1, k2, k3, k4, k5 = jax.random.split(key, 5)
    x = jax.random.normal(k1, (N, Cin, H, W), jnp.float32)
    w_off = jax.random.normal(k2, (2 * K * K, Cin, K, K), jnp.float32) * 0.05
    b_off = jax.random.normal(k3, (2 * K * K,), jnp.float32) * 0.05
    w_def = jax.random.normal(k4, (Cout, Cin, K, K), jnp.float32) * 0.10
    b_def = jax.random.normal(k5, (Cout,), jnp.float32) * 0.10

    fwd = jax.jit(functools.partial(deform_conv2d_forward,
                                    K=K, stride=stride, pad=pad))
    out = jax.block_until_ready(fwd(x, w_off, b_off, w_def, b_def))
    assert out.shape == (N, Cout, H, W), out.shape
    assert bool(jnp.all(jnp.isfinite(out)))
    print("KERNEL_OK")
</pallas_src>

<mosaic_0001>
module attributes {stable_mosaic.version = 11 : i64} {
  func.func @_mm_bias_kernel(%arg0: i32, %arg1: memref<16x48xbf16, #tpu.memory_space<vmem>>, %arg2: memref<48x256xbf16, #tpu.memory_space<vmem>>, %arg3: memref<16x1xf32, #tpu.memory_space<vmem>>, %arg4: memref<16x256xf32, #tpu.memory_space<vmem>>) attributes {dimension_semantics = [#tpu.dimension_semantics<parallel>], iteration_bounds = array<i64: 2>, scalar_prefetch = 0 : i64, scratch_operands = 0 : i64, tpu.core_type = #tpu.core_type<tc>, window_params = [{pipeline_mode = #tpu.pipeline_mode<synchronous>, transform_indices = @transform_0, window_bounds = array<i64: 16, 48>}, {transform_indices = @transform_1, window_bounds = array<i64: 48, 256>}, {pipeline_mode = #tpu.pipeline_mode<synchronous>, transform_indices = @transform_2, window_bounds = array<i64: 16, 1>}, {transform_indices = @transform_3, window_bounds = array<i64: 16, 256>}]} {
    %c0 = arith.constant 0 : index
    %c0_0 = arith.constant 0 : index
    %0 = vector.load %arg1[%c0, %c0_0] : memref<16x48xbf16, #tpu.memory_space<vmem>>, vector<16x48xbf16>
    %c0_1 = arith.constant 0 : index
    %c0_2 = arith.constant 0 : index
    %1 = vector.load %arg2[%c0_1, %c0_2] : memref<48x256xbf16, #tpu.memory_space<vmem>>, vector<48x256xbf16>
    %cst = arith.constant dense<0.000000e+00> : vector<16x256xf32>
    %2 = tpu.matmul %0, %1, %cst {dimension_numbers = #tpu.dot_dimension_numbers<[1], [0], [0], [1], [0, 0, 1, 1], [], []>} : vector<16x48xbf16>, vector<48x256xbf16>, vector<16x256xf32> -> vector<16x256xf32>
    %c0_3 = arith.constant 0 : index
    %c0_4 = arith.constant 0 : index
    %3 = vector.load %arg3[%c0_3, %c0_4] : memref<16x1xf32, #tpu.memory_space<vmem>>, vector<16x1xf32>
    %4 = vector.broadcast %3 : vector<16x1xf32> to vector<16x256xf32>
    %5 = arith.addf %2, %4 : vector<16x256xf32>
    %c0_5 = arith.constant 0 : index
    %c0_6 = arith.constant 0 : index
    %6 = vector.load %arg4[%c0_5, %c0_6] : memref<16x256xf32, #tpu.memory_space<vmem>>, vector<16x256xf32>
    tpu.vector_store %arg4[%c0_5, %c0_6], %5 {strides = array<i32>} : memref<16x256xf32, #tpu.memory_space<vmem>>, vector<16x256xf32>,
    return
  }
  func.func @transform_0(%arg0: i32) -> (i32, i32) {
    %c0_i32 = arith.constant 0 : i32
    %c0_i32_0 = arith.constant 0 : i32
    %c0_i32_1 = arith.constant 0 : i32
    return %c0_i32, %c0_i32_0 : i32, i32
  }
  func.func @transform_1(%arg0: i32) -> (i32, i32) {
    %c0_i32 = arith.constant 0 : i32
    %c0_i32_0 = arith.constant 0 : i32
    return %c0_i32, %arg0 : i32, i32
  }
  func.func @transform_2(%arg0: i32) -> (i32, i32) {
    %c0_i32 = arith.constant 0 : i32
    %c0_i32_0 = arith.constant 0 : i32
    %c0_i32_1 = arith.constant 0 : i32
    return %c0_i32, %c0_i32_0 : i32, i32
  }
  func.func @transform_3(%arg0: i32) -> (i32, i32) {
    %c0_i32 = arith.constant 0 : i32
    %c0_i32_0 = arith.constant 0 : i32
    return %c0_i32, %arg0 : i32, i32
  }
}

</mosaic_0001>

<bundles_post_ra>
// kernel: deform_conv2d_forward.1
= control target key start
LH: loop header
LB: loop body
LE: loop exit
PB: predicated region body
PF: predicated region fallthrough
CT: control target
= control target key end

     0   :  { %s524_s12 = smov 0   ;;  %s526_s13 = smov 0   ;;  %s593_s0 = inlined_call_operand.vmem [shape: bf16[16,48], index: 0, kind: input, shape index: {}]   ;;  %s594_s1 = inlined_call_operand.vmem [shape: bf16[48,512], index: 1, kind: input, shape index: {}]   ;;  %s595_s2 = inlined_call_operand.vmem [shape: f32[16,1], index: 2, kind: input, shape index: {}]   ;;  %s596_s3 = inlined_call_operand.vmem [shape: f32[16,512], index: 3, kind: output, shape index: {}]  }
   0x1   :  { %s528_s14 = smov 0  }
   0x2 LB: > { %s418_s15 = sadd.s32 4294967295, %s501_s14   ;;  %s541_s16 = sadd.s32 1, %s501_s14   ;;  %s501_s14 = sphi %s528_s14, %s600_s14   ;;  %s497_s13 = sphi %s526_s13, %s599_s13   ;;  %s493_s12 = sphi %s524_s12, %s598_s12  }
   0x3   : > { %s38_s17 = ssub.s32 %s501_s14, %s541_s16  ;;  %s41_s18 = sadd.s32 1, %s497_s13 }
   0x4   : > { %p39_p0 = scmp.eq.s32.totalorder %s38_s17, 0  ;;  %p48_p1 = scmp.ne.s32.totalorder %s497_s13, %s493_s12 }
   0x5   : > { %p49_p2 = scmp.eq.s32.totalorder %s501_s14, 0  ;;  %p99_p3 = scmp.eq.s32.totalorder %s418_s15, 1 }
   0x6   : > { %s552_s19 = scalar_select %p39_p0, %s497_s13, %s41_s18  }
   0x7   : > { %p50_p4 = por %p49_p2, %p48_p1  ;;  %p554_p5 = por %p99_p3, %p48_p1 }
   0x8   : > { %p421_p6 = scmp.ge.s32.totalorder %s501_s14, 2 }
   0xa   : > { %127 = sbr.rel (%p421_p6) target bundleno = 24 (0x18), region = 24 }
  0x11   : > { %130 = sbr.rel (!%p50_p4) target bundleno = 24 (0x18), region = 28  ;;  %s132_s21 = sand.u32 (%p50_p4), 1, %s497_s13  }
  0x12   : > { %s439_s22 = sshll.u32 (%p50_p4), %s501_s14, 3  ;;  %s441_s23 = smul.u32 (%p50_p4), 48, %s132_s21 }
  0x13   : > { %s137_s26 = scalar_lea.vmem (%p50_p4), %s594_s1, %s439_s22 }
  0x14   : > { %v175_v0 = vld [vmem:[%s137_s26] sm:$0xff] (%p50_p4)  ;;  %v177_v1 = vld [vmem:[%s137_s26 + $0x10] sm:$0xff] (%p50_p4)  ;;  %s134_s27 = scalar_lea.vmem (%p50_p4), [#allocation2], %s441_s23 }
  0x15   : > { %v179_v2 = vld [vmem:[%s137_s26 + $0x20] sm:$0xff] (%p50_p4)  ;;  %v181_v3 = vld [vmem:[%s137_s26 + $0x30] sm:$0xff] (%p50_p4)  ;;  %176 = vst [vmem:[%s134_s27] sm:$0xff] (%p50_p4), %v175_v0  ;;  %178 = vst [vmem:[%s134_s27 + $0x8] sm:$0xff] (%p50_p4), %v177_v1 }
  0x16   : > { %v183_v4 = vld [vmem:[%s137_s26 + $0x40] sm:$0xff] (%p50_p4)  ;;  %v185_v5 = vld [vmem:[%s137_s26 + $0x50] sm:$0xff] (%p50_p4)  ;;  %180 = vst [vmem:[%s134_s27 + $0x10] sm:$0xff] (%p50_p4), %v179_v2  ;;  %182 = vst [vmem:[%s134_s27 + $0x18] sm:$0xff] (%p50_p4), %v181_v3 }
  0x17   : > { %184 = vst [vmem:[%s134_s27 + $0x20] sm:$0xff] (%p50_p4), %v183_v4  ;;  %186 = vst [vmem:[%s134_s27 + $0x28] sm:$0xff] (%p50_p4), %v185_v5 }
  0x18 PF: > { %p424_p7 = scmp.ge.s32.totalorder %s501_s14, 1  ;;  %p191_p8 = scmp.lt.s32.totalorder %s501_s14, 3 }
  0x1a   : > { %p192_p9 = pnand %p424_p7, %p191_p8 }
  0x1b   : > { %s198_s28 = sand.u32 (!%p192_p9), 1, %s493_s12   ;;  %v503_v6 = vmov (!%p192_p9), 0   ;;  %v231_v7 = vld [vmem:[%s595_s2] sm:$0xff] (!%p192_p9)  ;;  %v232_v8 = vld [vmem:[%s595_s2 + $0x8] sm:$0xff] (!%p192_p9)  ;;  %vm278_vm0 = vcmask (!%p192_p9), 392192  }
  0x1c   : > { %195 = sbr.rel (%p192_p9) target bundleno = 271 (0x10f), region = 66  ;;  %314 = vmatprep.mubr.bf16.mxu0 (!%p192_p9), %v503_v6  ;;  %468 = vset.pattern.permute.xlu0 (!%p192_p9), %v503_v6  ;;  %v478_v15 = vld [vmem:[%s593_s0] sm:$0xff] (!%p192_p9)   ;;  %s425_s10 = sshll.u32 (!%p192_p9), %s198_s28, 5 }
  0x1d   : > { %s442_s29 = smul.u32 (!%p192_p9), 48, %s198_s28  ;;  %235 = vperm.xlu0 (!%p192_p9), %468, %v231_v7   ;;  %s219_s11 = scalar_lea.vmem (!%p192_p9), [#allocation3], %s425_s10 }
  0x1f   : > { %s200_s7 = scalar_lea.vmem (!%p192_p9), [#allocation2], %s442_s29 }
  0x20   : > { %v469_v9 = vld [vmem:[%s200_s7 + $0x4] ss:$8 sps:$4 sm:$0xff] (!%p192_p9)   ;;  %v471_v10 = vld [vmem:[%s200_s7] ss:$8 sps:$4 sm:$0xff] (!%p192_p9)   ;;  %v472_v11 = vld [vmem:[%s200_s7 + $0x14] ss:$8 sps:$4 sm:$0xff] (!%p192_p9)  }
  0x21   : > { %282 = vmatprep.subr.bf16.mxu0 (!%p192_p9), %v469_v9  ;;  %240 = vperm.xlu0 (!%p192_p9), %468, %v232_v8   ;;  %v474_v12 = vld [vmem:[%s200_s7 + $0x10] ss:$8 sps:$4 sm:$0xff] (!%p192_p9)   ;;  %v475_v13 = vld [vmem:[%s200_s7 + $0x24] ss:$8 sps:$4 sm:$0xff] (!%p192_p9)   ;;  %v477_v14 = vld [vmem:[%s200_s7 + $0x20] ss:$8 sps:$4 sm:$0xff] (!%p192_p9)  }
  0x22   : > { %283 = vmatpush1.bf16.msra.mxu0 (!%p192_p9), %v471_v10 }
  0x23   : > { %284 = vmatprep.subr.bf16.mxu0 %v472_v11  ;;  %s440_s12 = sshll.u32 (%p554_p5), %s418_s15, 4 }
  0x24   : > { %s338_s21 = scalar_lea.vmem (%p554_p5), %s596_s3, %s440_s12 }
  0x26   : > { %285 = vmatpush1.bf16.msra.mxu0 %v474_v12 }
  0x27   : > { %286 = vmatprep.subr.bf16.mxu0 %v475_v13 }
  0x2a   : > { %287 = vmatpush1.bf16.msra.mxu0 %v477_v14 }
  0x2d   : > { %433 = vmatmul.mubr.msk.bf16.vlgmr.msra.gmra.mrb[0].mxu0 %vm278_vm0, %v478_v15 }
  0x9c   : > { %v236_v16 = vpop.permute.xlu0 %235 }
  0xa0   : > { %v241_v20 = vpop.permute.xlu0 %240 }
 0x100   : > { %v316_v17 = vpop.f32.mrb[0].mxu0  ;;  %335 = sbr.rel (!%p554_p5) target bundleno = 271 (0x10f), region = 74 }
 0x101   : > { %v317_v18 = vadd.f32 %v316_v17, %v236_v16  ;;  %v318_v19 = vpop.f32.mrb[1].mxu0 }
 0x102   : > { %v319_v21 = vadd.f32 %v318_v19, %v236_v16  ;;  %v320_v22 = vpop.f32.mrb[2].mxu0 }
 0x103   : > { %325 = vst [vmem:[%s219_s11] sm:$0xff] %v317_v18  ;;  %v321_v23 = vadd.f32 %v320_v22, %v241_v20  ;;  %v322_v24 = vpop.f32.mrb[3].mxu0 }
 0x104   : > { %326 = vst [vmem:[%s219_s11 + $0x8] sm:$0xff] %v319_v21  ;;  %v323_v25 = vadd.f32 %v322_v24, %v241_v20 }
 0x105   : > { %327 = vst [vmem:[%s219_s11 + $0x10] sm:$0xff] %v321_v23 }
 0x106   : > { %328 = vst [vmem:[%s219_s11 + $0x18] sm:$0xff] %v323_v25 }
 0x10a   : > { %v351_v26 = vld [vmem:[%s219_s11] sm:$0xff] }
 0x10b   : > { %v353_v27 = vld [vmem:[%s219_s11 + $0x8] sm:$0xff]  ;;  %352 = vst [vmem:[%s338_s21] sm:$0xff] %v351_v26 }
 0x10c   : > { %v355_v28 = vld [vmem:[%s219_s11 + $0x10] sm:$0xff]  ;;  %354 = vst [vmem:[%s338_s21 + $0x8] sm:$0xff] %v353_v27 }
 0x10d   : > { %v357_v29 = vld [vmem:[%s219_s11 + $0x18] sm:$0xff]  ;;  %356 = vst [vmem:[%s338_s21 + $0x20] sm:$0xff] %v355_v28 }
 0x10e   : > { %358 = vst [vmem:[%s338_s21 + $0x28] sm:$0xff] %v357_v29 }
 0x10f PF: > { %p10_p10 = scmp.ge.s32.totalorder %s541_s16, 4   ;;  %s598_s12 = smov %s497_s13 }
 0x110   : > { %s599_s13 = smov %s552_s19  ;;  %s600_s14 = smov %s541_s16 }
 0x111   :  { %12 = sbr.rel (!%p10_p10) target bundleno = 2 (0x2), region = 128 }

</bundles_post_ra>
